<compile_context>
chip_gen: v6e
topology: v6e:2x2x1
jax: 0.10.0
libtpu: 0.0.40
codegen_flags: <defaults>
</compile_context>

<pallas_src>
import numpy as np
import jax
import jax.numpy as jnp
from jax.experimental import pallas as pl
from jax.experimental.pallas import tpu as pltpu


# ----------------------------------------------------------------------------
# Deterministic "viridis-like" colormap: 11 anchors, linearly interpolated.
# ----------------------------------------------------------------------------
_VIRIDIS_ANCHORS = np.array(
    [
        [0.267004, 0.004874, 0.329415],
        [0.282623, 0.140926, 0.457517],
        [0.253935, 0.265254, 0.529983],
        [0.206756, 0.371758, 0.553117],
        [0.163625, 0.471133, 0.558148],
        [0.127568, 0.566949, 0.550556],
        [0.134692, 0.658636, 0.517649],
        [0.266941, 0.748751, 0.440573],
        [0.477504, 0.821444, 0.318195],
        [0.741388, 0.873449, 0.149561],
        [0.993248, 0.906157, 0.143936],
    ],
    dtype=np.float32,
)

_N_LUT = 256                               # matplotlib-style LUT resolution
_N_SEG = _VIRIDIS_ANCHORS.shape[0] - 1     # 10 linear segments


def build_colormap_lut(n_entries: int = _N_LUT) -> jnp.ndarray:
    """256x3 LUT by linear interpolation of the anchors (reference check only)."""
    anchor_pos = np.linspace(0.0, 1.0, _VIRIDIS_ANCHORS.shape[0])
    query = np.linspace(0.0, 1.0, n_entries)
    lut = np.stack(
        [np.interp(query, anchor_pos, _VIRIDIS_ANCHORS[:, c]) for c in range(3)],
        axis=-1,
    ).astype(np.float32)
    return jnp.asarray(lut)


# ----------------------------------------------------------------------------
# Pallas kernel: normalize + quantize + piecewise-linear colormap on the VPU.
# ----------------------------------------------------------------------------
def _colormap_kernel(params_ref, spec_ref, out_ref):
    # params_ref: SMEM (2,) f32          -> [mn, scale], scale = N / (mx - mn)
    # spec_ref  : VMEM (TILE_R, LANES)   -> pixel tile of spectrogram[0]
    # out_ref   : VMEM (3, TILE_R, LANES)-> RGB tile, channel-first
    mn = params_ref[0]
    scale = params_ref[1]
    s = spec_ref[...]

    # Normalization + LUT quantization fused into a single multiply:
    #   idx = clip(floor((s - mn) * N / (mx - mn)), 0, N - 1)
    idx = jnp.clip(jnp.floor((s - mn) * scale), 0.0, float(_N_LUT - 1))

    # LUT entry `idx` equals linear interpolation of the anchors at position
    # q = idx / (N - 1): segment = floor(q * N_SEG), frac = q * N_SEG - segment.
    seg_f = idx * (float(_N_SEG) / float(_N_LUT - 1))
    seg = jnp.minimum(jnp.floor(seg_f), float(_N_SEG - 1))
    frac = seg_f - seg

    # 9 compares, shared across the three channels.
    ge = [seg >= float(k) for k in range(1, _N_SEG)]

    a = _VIRIDIS_ANCHORS
    for ch in range(3):
        lo = jnp.full_like(s, float(a[0, ch]))                 # anchor[seg]
        dl = jnp.full_like(s, float(a[1, ch] - a[0, ch]))      # anchor[seg+1]-anchor[seg]
        for k in range(1, _N_SEG):
            lo = jnp.where(ge[k - 1], float(a[k, ch]), lo)
            dl = jnp.where(ge[k - 1], float(a[k + 1, ch] - a[k, ch]), dl)
        out_ref[ch, :, :] = lo + frac * dl


def _round_up(x: int, m: int) -> int:
    return ((x + m - 1) // m) * m


def spectrogram_to_colormap(spectrogram: jnp.ndarray,
                            db: bool = True,
                            *,
                            lane_width: int = 512,
                            tile_rows: int = 128) -> jnp.ndarray:
    """JAX/Pallas equivalent of SpectrogramToColormapTransform.forward.

    spectrogram: (B, H, W) float32
    returns:     (3, H, W) float32 (colored batch element 0, CHW)
    """
    b, h, w = spectrogram.shape
    p = h * w

    spec = spectrogram.astype(jnp.float32)
    if not db:
        # NOTE: non-positive inputs yield -inf/NaN, exactly like torch.log2.
        spec = jnp.log2(spec)

    # Global min/max over the FULL batch: plain XLA reduction (the kernel only
    # ever reads spectrogram[0]).
    mn = jnp.min(spec)
    mx = jnp.max(spec)
    # Guard mx == mn (the torch reference would divide by zero here).
    scale = jnp.where(mx > mn, float(_N_LUT) / (mx - mn), jnp.float32(0.0))
    params = jnp.stack([mn, scale]).astype(jnp.float32)          # (2,) SMEM scalars

    # Lay out the pixels of batch element 0 as a dense (rows, lanes) slab.
    lanes = lane_width                                            # multiple of 128
    tr = min(tile_rows, _round_up(pl.cdiv(p, lanes), 8))          # rows per grid step
    p_pad = _round_up(p, lanes * tr)
    rows = p_pad // lanes
    grid = (rows // tr,)

    spec0 = spec[0].reshape(-1)
    if p_pad > p:
        spec0 = jnp.pad(spec0, (0, p_pad - p))
    spec0 = spec0.reshape(rows, lanes)

    out = pl.pallas_call(
        _colormap_kernel,
        out_shape=jax.ShapeDtypeStruct((3, rows, lanes), jnp.float32),
        grid=grid,
        in_specs=[
            pl.BlockSpec(memory_space=pltpu.MemorySpace.SMEM),     # [mn, scale]
            pl.BlockSpec((tr, lanes), lambda i: (i, 0)),           # pixel tile
        ],
        out_specs=pl.BlockSpec((3, tr, lanes), lambda i: (0, i, 0)),
        compiler_params=pltpu.CompilerParams(
            dimension_semantics=("parallel",),
            vmem_limit_bytes=32 * 1024 * 1024,
        ),
    )(params, spec0)

    return out.reshape(3, p_pad)[:, :p].reshape(3, h, w)


if __name__ == "__main__":
    key = jax.random.PRNGKey(0)
    B, H, W = 2, 16, 16
    # Positive "spectrogram" values (so the db=False log2 path is also valid).
    x = jax.random.uniform(
        key, (B, H, W), dtype=jnp.float32, minval=0.01, maxval=10.0
    )

    lut = build_colormap_lut(_N_LUT)   # used only by the pure-JAX reference

    def reference(spectrogram, db=True):
        spec = spectrogram.astype(jnp.float32)
        if not db:
            spec = jnp.log2(spec)
        mn_ = jnp.min(spec)
        mx_ = jnp.max(spec)
        sc_ = jnp.where(mx_ > mn_, float(_N_LUT) / (mx_ - mn_), jnp.float32(0.0))
        idx = jnp.clip(jnp.floor((spec[0] - mn_) * sc_),
                       0.0, float(_N_LUT - 1)).astype(jnp.int32)
        return jnp.transpose(jnp.take(lut, idx, axis=0), (2, 0, 1))   # (3, H, W)

    for db_flag in (True, False):
        got = jax.block_until_ready(spectrogram_to_colormap(x, db=db_flag))
        want = jax.block_until_ready(reference(x, db=db_flag))

        assert got.shape == (3, H, W), got.shape
        assert got.dtype == jnp.float32
        assert bool(jnp.all(jnp.isfinite(got)))
        assert bool(jnp.all(got >= 0.0)) and bool(jnp.all(got <= 1.0))
        err = float(jnp.max(jnp.abs(got - want)))
        assert err < 1e-4, f"max abs error {err} (db={db_flag})"

    print("KERNEL_OK")
</pallas_src>

<mosaic_0001>
module attributes {stable_mosaic.version = 11 : i64} {
  func.func @_colormap_kernel(%arg0: i32, %arg1: memref<2xf32, #tpu.memory_space<smem>>, %arg2: memref<8x512xf32, #tpu.memory_space<vmem>>, %arg3: memref<3x8x512xf32, #tpu.memory_space<vmem>>) attributes {dimension_semantics = [#tpu.dimension_semantics<parallel>], iteration_bounds = array<i64: 1>, scalar_prefetch = 0 : i64, scratch_operands = 0 : i64, tpu.core_type = #tpu.core_type<tc>, window_params = [{transform_indices = @transform_0, window_bounds = array<i64: 2>}, {transform_indices = @transform_1, window_bounds = array<i64: 8, 512>}, {transform_indices = @transform_2, window_bounds = array<i64: 3, 8, 512>}]} {
    %c0 = arith.constant 0 : index
    %0 = memref.load %arg1[%c0] : memref<2xf32, #tpu.memory_space<smem>>
    %c1 = arith.constant 1 : index
    %1 = memref.load %arg1[%c1] : memref<2xf32, #tpu.memory_space<smem>>
    %c0_0 = arith.constant 0 : index
    %c0_1 = arith.constant 0 : index
    %2 = vector.load %arg2[%c0_0, %c0_1] : memref<8x512xf32, #tpu.memory_space<vmem>>, vector<8x512xf32>
    %3 = vector.broadcast %0 : f32 to vector<8x512xf32>
    %4 = arith.subf %2, %3 : vector<8x512xf32>
    %5 = vector.broadcast %1 : f32 to vector<8x512xf32>
    %6 = arith.mulf %4, %5 : vector<8x512xf32>
    %7 = math.floor %6 : vector<8x512xf32>
    %cst = arith.constant 0.000000e+00 : f32
    %cst_2 = arith.constant 2.550000e+02 : f32
    %8 = vector.broadcast %cst : f32 to vector<8x512xf32>
    %9 = arith.maximumf %8, %7 : vector<8x512xf32>
    %10 = vector.broadcast %cst_2 : f32 to vector<8x512xf32>
    %11 = arith.minimumf %10, %9 : vector<8x512xf32>
    %cst_3 = arith.constant 0.0392156877 : f32
    %12 = vector.broadcast %cst_3 : f32 to vector<8x512xf32>
    %13 = arith.mulf %11, %12 : vector<8x512xf32>
    %14 = math.floor %13 : vector<8x512xf32>
    %cst_4 = arith.constant 9.000000e+00 : f32
    %15 = vector.broadcast %cst_4 : f32 to vector<8x512xf32>
    %16 = arith.minimumf %14, %15 : vector<8x512xf32>
    %17 = arith.subf %13, %16 : vector<8x512xf32>
    %cst_5 = arith.constant 1.000000e+00 : f32
    %18 = vector.broadcast %cst_5 : f32 to vector<8x512xf32>
    %19 = arith.cmpf oge, %16, %18 : vector<8x512xf32>
    %cst_6 = arith.constant 2.000000e+00 : f32
    %20 = vector.broadcast %cst_6 : f32 to vector<8x512xf32>
    %21 = arith.cmpf oge, %16, %20 : vector<8x512xf32>
    %cst_7 = arith.constant 3.000000e+00 : f32
    %22 = vector.broadcast %cst_7 : f32 to vector<8x512xf32>
    %23 = arith.cmpf oge, %16, %22 : vector<8x512xf32>
    %cst_8 = arith.constant 4.000000e+00 : f32
    %24 = vector.broadcast %cst_8 : f32 to vector<8x512xf32>
    %25 = arith.cmpf oge, %16, %24 : vector<8x512xf32>
    %cst_9 = arith.constant 5.000000e+00 : f32
    %26 = vector.broadcast %cst_9 : f32 to vector<8x512xf32>
    %27 = arith.cmpf oge, %16, %26 : vector<8x512xf32>
    %cst_10 = arith.constant 6.000000e+00 : f32
    %28 = vector.broadcast %cst_10 : f32 to vector<8x512xf32>
    %29 = arith.cmpf oge, %16, %28 : vector<8x512xf32>
    %cst_11 = arith.constant 7.000000e+00 : f32
    %30 = vector.broadcast %cst_11 : f32 to vector<8x512xf32>
    %31 = arith.cmpf oge, %16, %30 : vector<8x512xf32>
    %cst_12 = arith.constant 8.000000e+00 : f32
    %32 = vector.broadcast %cst_12 : f32 to vector<8x512xf32>
    %33 = arith.cmpf oge, %16, %32 : vector<8x512xf32>
    %cst_13 = arith.constant 9.000000e+00 : f32
    %34 = vector.broadcast %cst_13 : f32 to vector<8x512xf32>
    %35 = arith.cmpf oge, %16, %34 : vector<8x512xf32>
    %cst_14 = arith.constant 2.670040e-01 : f32
    %36 = vector.broadcast %cst_14 : f32 to vector<8x512xf32>
    %cst_15 = arith.constant 0.0156189799 : f32
    %37 = vector.broadcast %cst_15 : f32 to vector<8x512xf32>
    %cst_16 = arith.constant 2.826230e-01 : f32
    %38 = vector.broadcast %cst_16 : f32 to vector<8x512xf32>
    %39 = arith.select %19, %38, %36 : vector<8x512xi1>, vector<8x512xf32>
    %cst_17 = arith.constant -0.0286879838 : f32
    %40 = vector.broadcast %cst_17 : f32 to vector<8x512xf32>
    %41 = arith.select %19, %40, %37 : vector<8x512xi1>, vector<8x512xf32>
    %cst_18 = arith.constant 2.539350e-01 : f32
    %42 = vector.broadcast %cst_18 : f32 to vector<8x512xf32>
    %43 = arith.select %21, %42, %39 : vector<8x512xi1>, vector<8x512xf32>
    %cst_19 = arith.constant -0.0471790135 : f32
    %44 = vector.broadcast %cst_19 : f32 to vector<8x512xf32>
    %45 = arith.select %21, %44, %41 : vector<8x512xi1>, vector<8x512xf32>
    %cst_20 = arith.constant 2.067560e-01 : f32
    %46 = vector.broadcast %cst_20 : f32 to vector<8x512xf32>
    %47 = arith.select %23, %46, %43 : vector<8x512xi1>, vector<8x512xf32>
    %cst_21 = arith.constant -0.0431309938 : f32
    %48 = vector.broadcast %cst_21 : f32 to vector<8x512xf32>
    %49 = arith.select %23, %48, %45 : vector<8x512xi1>, vector<8x512xf32>
    %cst_22 = arith.constant 1.636250e-01 : f32
    %50 = vector.broadcast %cst_22 : f32 to vector<8x512xf32>
    %51 = arith.select %25, %50, %47 : vector<8x512xi1>, vector<8x512xf32>
    %cst_23 = arith.constant -0.0360569954 : f32
    %52 = vector.broadcast %cst_23 : f32 to vector<8x512xf32>
    %53 = arith.select %25, %52, %49 : vector<8x512xi1>, vector<8x512xf32>
    %cst_24 = arith.constant 1.275680e-01 : f32
    %54 = vector.broadcast %cst_24 : f32 to vector<8x512xf32>
    %55 = arith.select %27, %54, %51 : vector<8x512xi1>, vector<8x512xf32>
    %cst_25 = arith.constant 0.00712399184 : f32
    %56 = vector.broadcast %cst_25 : f32 to vector<8x512xf32>
    %57 = arith.select %27, %56, %53 : vector<8x512xi1>, vector<8x512xf32>
    %cst_26 = arith.constant 1.346920e-01 : f32
    %58 = vector.broadcast %cst_26 : f32 to vector<8x512xf32>
    %59 = arith.select %29, %58, %55 : vector<8x512xi1>, vector<8x512xf32>
    %cst_27 = arith.constant 0.132249013 : f32
    %60 = vector.broadcast %cst_27 : f32 to vector<8x512xf32>
    %61 = arith.select %29, %60, %57 : vector<8x512xi1>, vector<8x512xf32>
    %cst_28 = arith.constant 2.669410e-01 : f32
    %62 = vector.broadcast %cst_28 : f32 to vector<8x512xf32>
    %63 = arith.select %31, %62, %59 : vector<8x512xi1>, vector<8x512xf32>
    %cst_29 = arith.constant 0.210562974 : f32
    %64 = vector.broadcast %cst_29 : f32 to vector<8x512xf32>
    %65 = arith.select %31, %64, %61 : vector<8x512xi1>, vector<8x512xf32>
    %cst_30 = arith.constant 4.775040e-01 : f32
    %66 = vector.broadcast %cst_30 : f32 to vector<8x512xf32>
    %67 = arith.select %33, %66, %63 : vector<8x512xi1>, vector<8x512xf32>
    %cst_31 = arith.constant 0.263884038 : f32
    %68 = vector.broadcast %cst_31 : f32 to vector<8x512xf32>
    %69 = arith.select %33, %68, %65 : vector<8x512xi1>, vector<8x512xf32>
    %cst_32 = arith.constant 7.413880e-01 : f32
    %70 = vector.broadcast %cst_32 : f32 to vector<8x512xf32>
    %71 = arith.select %35, %70, %67 : vector<8x512xi1>, vector<8x512xf32>
    %cst_33 = arith.constant 0.251859963 : f32
    %72 = vector.broadcast %cst_33 : f32 to vector<8x512xf32>
    %73 = arith.select %35, %72, %69 : vector<8x512xi1>, vector<8x512xf32>
    %74 = arith.mulf %17, %73 : vector<8x512xf32>
    %75 = arith.addf %71, %74 : vector<8x512xf32>
    %c0_34 = arith.constant 0 : index
    %c0_35 = arith.constant 0 : index
    %c0_36 = arith.constant 0 : index
    %76 = vector.load %arg3[%c0_34, %c0_35, %c0_36] : memref<3x8x512xf32, #tpu.memory_space<vmem>>, vector<1x8x512xf32>
    %77 = vector.shape_cast %76 : vector<1x8x512xf32> to vector<8x512xf32>
    %78 = vector.shape_cast %75 : vector<8x512xf32> to vector<1x8x512xf32>
    tpu.vector_store %arg3[%c0_34, %c0_35, %c0_36], %78 {strides = array<i32>} : memref<3x8x512xf32, #tpu.memory_space<vmem>>, vector<1x8x512xf32>,
    %cst_37 = arith.constant 4.874000e-03 : f32
    %79 = vector.broadcast %cst_37 : f32 to vector<8x512xf32>
    %cst_38 = arith.constant 1.360520e-01 : f32
    %80 = vector.broadcast %cst_38 : f32 to vector<8x512xf32>
    %cst_39 = arith.constant 1.409260e-01 : f32
    %81 = vector.broadcast %cst_39 : f32 to vector<8x512xf32>
    %82 = arith.select %19, %81, %79 : vector<8x512xi1>, vector<8x512xf32>
    %cst_40 = arith.constant 0.124327987 : f32
    %83 = vector.broadcast %cst_40 : f32 to vector<8x512xf32>
    %84 = arith.select %19, %83, %80 : vector<8x512xi1>, vector<8x512xf32>
    %cst_41 = arith.constant 2.652540e-01 : f32
    %85 = vector.broadcast %cst_41 : f32 to vector<8x512xf32>
    %86 = arith.select %21, %85, %82 : vector<8x512xi1>, vector<8x512xf32>
    %cst_42 = arith.constant 0.106504023 : f32
    %87 = vector.broadcast %cst_42 : f32 to vector<8x512xf32>
    %88 = arith.select %21, %87, %84 : vector<8x512xi1>, vector<8x512xf32>
    %cst_43 = arith.constant 3.717580e-01 : f32
    %89 = vector.broadcast %cst_43 : f32 to vector<8x512xf32>
    %90 = arith.select %23, %89, %86 : vector<8x512xi1>, vector<8x512xf32>
    %cst_44 = arith.constant 0.0993749797 : f32
    %91 = vector.broadcast %cst_44 : f32 to vector<8x512xf32>
    %92 = arith.select %23, %91, %88 : vector<8x512xi1>, vector<8x512xf32>
    %cst_45 = arith.constant 4.711330e-01 : f32
    %93 = vector.broadcast %cst_45 : f32 to vector<8x512xf32>
    %94 = arith.select %25, %93, %90 : vector<8x512xi1>, vector<8x512xf32>
    %cst_46 = arith.constant 0.0958160161 : f32
    %95 = vector.broadcast %cst_46 : f32 to vector<8x512xf32>
    %96 = arith.select %25, %95, %92 : vector<8x512xi1>, vector<8x512xf32>
    %cst_47 = arith.constant 5.669490e-01 : f32
    %97 = vector.broadcast %cst_47 : f32 to vector<8x512xf32>
    %98 = arith.select %27, %97, %94 : vector<8x512xi1>, vector<8x512xf32>
    %cst_48 = arith.constant 0.091686964 : f32
    %99 = vector.broadcast %cst_48 : f32 to vector<8x512xf32>
    %100 = arith.select %27, %99, %96 : vector<8x512xi1>, vector<8x512xf32>
    %cst_49 = arith.constant 6.586360e-01 : f32
    %101 = vector.broadcast %cst_49 : f32 to vector<8x512xf32>
    %102 = arith.select %29, %101, %98 : vector<8x512xi1>, vector<8x512xf32>
    %cst_50 = arith.constant 0.0901150107 : f32
    %103 = vector.broadcast %cst_50 : f32 to vector<8x512xf32>
    %104 = arith.select %29, %103, %100 : vector<8x512xi1>, vector<8x512xf32>
    %cst_51 = arith.constant 0.748750984 : f32
    %105 = vector.broadcast %cst_51 : f32 to vector<8x512xf32>
    %106 = arith.select %31, %105, %102 : vector<8x512xi1>, vector<8x512xf32>
    %cst_52 = arith.constant 0.0726929903 : f32
    %107 = vector.broadcast %cst_52 : f32 to vector<8x512xf32>
    %108 = arith.select %31, %107, %104 : vector<8x512xi1>, vector<8x512xf32>
    %cst_53 = arith.constant 0.821443974 : f32
    %109 = vector.broadcast %cst_53 : f32 to vector<8x512xf32>
    %110 = arith.select %33, %109, %106 : vector<8x512xi1>, vector<8x512xf32>
    %cst_54 = arith.constant 0.0520050526 : f32
    %111 = vector.broadcast %cst_54 : f32 to vector<8x512xf32>
    %112 = arith.select %33, %111, %108 : vector<8x512xi1>, vector<8x512xf32>
    %cst_55 = arith.constant 8.734490e-01 : f32
    %113 = vector.broadcast %cst_55 : f32 to vector<8x512xf32>
    %114 = arith.select %35, %113, %110 : vector<8x512xi1>, vector<8x512xf32>
    %cst_56 = arith.constant 0.0327079892 : f32
    %115 = vector.broadcast %cst_56 : f32 to vector<8x512xf32>
    %116 = arith.select %35, %115, %112 : vector<8x512xi1>, vector<8x512xf32>
    %117 = arith.mulf %17, %116 : vector<8x512xf32>
    %118 = arith.addf %114, %117 : vector<8x512xf32>
    %c1_57 = arith.constant 1 : index
    %c0_58 = arith.constant 0 : index
    %c0_59 = arith.constant 0 : index
    %119 = vector.load %arg3[%c1_57, %c0_58, %c0_59] : memref<3x8x512xf32, #tpu.memory_space<vmem>>, vector<1x8x512xf32>
    %120 = vector.shape_cast %119 : vector<1x8x512xf32> to vector<8x512xf32>
    %121 = vector.shape_cast %118 : vector<8x512xf32> to vector<1x8x512xf32>
    tpu.vector_store %arg3[%c1_57, %c0_58, %c0_59], %121 {strides = array<i32>} : memref<3x8x512xf32, #tpu.memory_space<vmem>>, vector<1x8x512xf32>,
    %cst_60 = arith.constant 3.294150e-01 : f32
    %122 = vector.broadcast %cst_60 : f32 to vector<8x512xf32>
    %cst_61 = arith.constant 1.281020e-01 : f32
    %123 = vector.broadcast %cst_61 : f32 to vector<8x512xf32>
    %cst_62 = arith.constant 4.575170e-01 : f32
    %124 = vector.broadcast %cst_62 : f32 to vector<8x512xf32>
    %125 = arith.select %19, %124, %122 : vector<8x512xi1>, vector<8x512xf32>
    %cst_63 = arith.constant 0.072465986 : f32
    %126 = vector.broadcast %cst_63 : f32 to vector<8x512xf32>
    %127 = arith.select %19, %126, %123 : vector<8x512xi1>, vector<8x512xf32>
    %cst_64 = arith.constant 5.299830e-01 : f32
    %128 = vector.broadcast %cst_64 : f32 to vector<8x512xf32>
    %129 = arith.select %21, %128, %125 : vector<8x512xi1>, vector<8x512xf32>
    %cst_65 = arith.constant 0.0231339931 : f32
    %130 = vector.broadcast %cst_65 : f32 to vector<8x512xf32>
    %131 = arith.select %21, %130, %127 : vector<8x512xi1>, vector<8x512xf32>
    %cst_66 = arith.constant 5.531170e-01 : f32
    %132 = vector.broadcast %cst_66 : f32 to vector<8x512xf32>
    %133 = arith.select %23, %132, %129 : vector<8x512xi1>, vector<8x512xf32>
    %cst_67 = arith.constant 0.00503104925 : f32
    %134 = vector.broadcast %cst_67 : f32 to vector<8x512xf32>
    %135 = arith.select %23, %134, %131 : vector<8x512xi1>, vector<8x512xf32>
    %cst_68 = arith.constant 5.581480e-01 : f32
    %136 = vector.broadcast %cst_68 : f32 to vector<8x512xf32>
    %137 = arith.select %25, %136, %133 : vector<8x512xi1>, vector<8x512xf32>
    %cst_69 = arith.constant -0.00759202242 : f32
    %138 = vector.broadcast %cst_69 : f32 to vector<8x512xf32>
    %139 = arith.select %25, %138, %135 : vector<8x512xi1>, vector<8x512xf32>
    %cst_70 = arith.constant 5.505560e-01 : f32
    %140 = vector.broadcast %cst_70 : f32 to vector<8x512xf32>
    %141 = arith.select %27, %140, %137 : vector<8x512xi1>, vector<8x512xf32>
    %cst_71 = arith.constant -0.0329070091 : f32
    %142 = vector.broadcast %cst_71 : f32 to vector<8x512xf32>
    %143 = arith.select %27, %142, %139 : vector<8x512xi1>, vector<8x512xf32>
    %cst_72 = arith.constant 5.176490e-01 : f32
    %144 = vector.broadcast %cst_72 : f32 to vector<8x512xf32>
    %145 = arith.select %29, %144, %141 : vector<8x512xi1>, vector<8x512xf32>
    %cst_73 = arith.constant -0.077075988 : f32
    %146 = vector.broadcast %cst_73 : f32 to vector<8x512xf32>
    %147 = arith.select %29, %146, %143 : vector<8x512xi1>, vector<8x512xf32>
    %cst_74 = arith.constant 4.405730e-01 : f32
    %148 = vector.broadcast %cst_74 : f32 to vector<8x512xf32>
    %149 = arith.select %31, %148, %145 : vector<8x512xi1>, vector<8x512xf32>
    %cst_75 = arith.constant -0.122378021 : f32
    %150 = vector.broadcast %cst_75 : f32 to vector<8x512xf32>
    %151 = arith.select %31, %150, %147 : vector<8x512xi1>, vector<8x512xf32>
    %cst_76 = arith.constant 3.181950e-01 : f32
    %152 = vector.broadcast %cst_76 : f32 to vector<8x512xf32>
    %153 = arith.select %33, %152, %149 : vector<8x512xi1>, vector<8x512xf32>
    %cst_77 = arith.constant -0.168633983 : f32
    %154 = vector.broadcast %cst_77 : f32 to vector<8x512xf32>
    %155 = arith.select %33, %154, %151 : vector<8x512xi1>, vector<8x512xf32>
    %cst_78 = arith.constant 1.495610e-01 : f32
    %156 = vector.broadcast %cst_78 : f32 to vector<8x512xf32>
    %157 = arith.select %35, %156, %153 : vector<8x512xi1>, vector<8x512xf32>
    %cst_79 = arith.constant -0.00562500954 : f32
    %158 = vector.broadcast %cst_79 : f32 to vector<8x512xf32>
    %159 = arith.select %35, %158, %155 : vector<8x512xi1>, vector<8x512xf32>
    %160 = arith.mulf %17, %159 : vector<8x512xf32>
    %161 = arith.addf %157, %160 : vector<8x512xf32>
    %c2 = arith.constant 2 : index
    %c0_80 = arith.constant 0 : index
    %c0_81 = arith.constant 0 : index
    %162 = vector.load %arg3[%c2, %c0_80, %c0_81] : memref<3x8x512xf32, #tpu.memory_space<vmem>>, vector<1x8x512xf32>
    %163 = vector.shape_cast %162 : vector<1x8x512xf32> to vector<8x512xf32>
    %164 = vector.shape_cast %161 : vector<8x512xf32> to vector<1x8x512xf32>
    tpu.vector_store %arg3[%c2, %c0_80, %c0_81], %164 {strides = array<i32>} : memref<3x8x512xf32, #tpu.memory_space<vmem>>, vector<1x8x512xf32>,
    return
  }
  func.func @transform_0(%arg0: i32) -> i32 {
    %c0_i32 = arith.constant 0 : i32
    %c0_i32_0 = arith.constant 0 : i32
    return %c0_i32 : i32
  }
  func.func @transform_1(%arg0: i32) -> (i32, i32) {
    %c0_i32 = arith.constant 0 : i32
    %c0_i32_0 = arith.constant 0 : i32
    return %arg0, %c0_i32 : i32, i32
  }
  func.func @transform_2(%arg0: i32) -> (i32, i32, i32) {
    %c0_i32 = arith.constant 0 : i32
    %c0_i32_0 = arith.constant 0 : i32
    %c0_i32_1 = arith.constant 0 : i32
    return %c0_i32, %arg0, %c0_i32_0 : i32, i32, i32
  }
}

</mosaic_0001>

<bundles_post_ra>
// kernel: tpu_custom_call.1
= control target key start
LH: loop header
LB: loop body
LE: loop exit
PB: predicated region body
PF: predicated region fallthrough
CT: control target
= control target key end

     0   :  { %7 = vsyncpa [#allocation5], 0  ;;  %s1020_s0 = inlined_call_operand.hbm [shape: f32[2], index: 0, kind: input, shape index: {}]   ;;  %s1021_s1 = inlined_call_operand.hbm [shape: f32[8,512], index: 1, kind: input, shape index: {}]   ;;  %s1022_s2 = inlined_call_operand.hbm [shape: f32[3,8,512], index: 2, kind: output, shape index: {}]  }
   0x1   :  { %8 = vsyncpa [#allocation3], 0 }
   0x2   :  { %9 = vsyncpa [#allocation4], 0  ;;  %s453_s9 = smov [#allocation2]   ;;  %s454_s12 = smov [#allocation6]  }
   0x3   :  { %17 = dma.hbm_to_smem %s1020_s0, 16, %s453_s9, [#allocation5]  }
   0x4   :  { %s24_s13 = sshll.u32 %s454_s12, 4  ;;  %s25_s13 = int_to_ptr.vmem [resolvable:$true] %s24_s13 }
   0x5   :  { %s415_s14 = scalar_lea.vmem %s25_s13, 512  ;;  %p420_p1 = scmp.lt.s32.totalorder %s25_s13, %s25_s13 }
   0x6   :  { %p416_p0 = scmp.ne.s32.totalorder %s25_s13, %s415_s14  ;;  %p421_p2 = scmp.lt.s32.totalorder %s415_s14, %s415_s14 }
   0x8   :  { %p422_p3 = por %p421_p2, %p420_p1 }
   0xa   :  { %p423_p4 = pnand %p422_p3, %p416_p0 }
   0xc   :  { %426 = shalt.err (!%p423_p4)
}
   0xd   :  { %27 = dma.hbm_to_vmem [thread:$0]  %s1021_s1, 512, %s25_s13, [#allocation3]  }
   0xe   :  { %447 = dma.done.wait [#allocation5], 16  }
   0xf   :  { %448 = vsyncadd [#allocation5], 4294967280 }
  0x10   :  { %449 = dma.done.wait [#allocation3], 512  }
  0x11   :  { %450 = vsyncadd [#allocation3], 4294966784 }
  0x12   :  { %34 = sfence }
  0x13   :  { %s35_s0 = sld [smem:[#allocation2]]  ;;  %v37_v0 = vld [vmem:[#allocation6] sm:$0xff]  ;;  %v38_v1 = vld [vmem:[#allocation6 + $0x8] sm:$0xff]  ;;  %v39_v2 = vld [vmem:[#allocation6 + $0x10] sm:$0xff]  ;;  %v455_v39 = vmov 0.267004  }
  0x14   :  { %s387_s17 = sld [smem:[#allocation2 + $0x1]]  ;;  %v40_v3 = vld [vmem:[#allocation6 + $0x18] sm:$0xff]  ;;  %v456_v41 = vmov 0.01561898   ;;  %s461_s1 = smov [#allocation7]  }
  0x15   :  { %s374_s18 = sshll.u32 %s461_s1, 4  ;;  %s375_s18 = int_to_ptr.vmem [resolvable:$true] %s374_s18 }
  0x16   :  { %s427_s19 = scalar_lea.vmem %s375_s18, 1536  ;;  %p432_p6 = scmp.lt.s32.totalorder %s375_s18, %s375_s18 }
  0x17   :  { %p428_p5 = scmp.ne.s32.totalorder %s375_s18, %s427_s19  ;;  %p433_p7 = scmp.lt.s32.totalorder %s427_s19, %s427_s19 }
  0x19   :  { %v41_v4 = vstv %s35_s0  ;;  %p434_p8 = por %p433_p7, %p432_p6 }
  0x1a   :  { %v42_v5 = vsub.f32 %v37_v0, %v41_v4  ;;  %v46_v6 = vstv %s387_s17  ;;  %v43_v7 = vsub.f32 %v38_v1, %v41_v4  ;;  %v44_v8 = vsub.f32 %v39_v2, %v41_v4 }
  0x1b   :  { %v45_v9 = vsub.f32 %v40_v3, %v41_v4  ;;  %p435_p9 = pnand %p434_p8, %p428_p5 }
  0x1c   :  { %v47_v10 = vmul.f32 %v46_v6, %v42_v5  ;;  %v48_v11 = vmul.f32 %v46_v6, %v43_v7  ;;  %v49_v12 = vmul.f32 %v46_v6, %v44_v8 }
  0x1d   :  { %v50_v13 = vmul.f32 %v46_v6, %v45_v9 }
  0x1e   :  { %v51_v14 = vfloor.f32 %v47_v10  ;;  %v52_v15 = vfloor.f32 %v48_v11  ;;  %v53_v16 = vfloor.f32 %v49_v12 }
  0x1f   :  { %v54_v17 = vfloor.f32 %v50_v13 }
  0x20   :  { %v55_v18 = vmax.f32 %v51_v14, 0.0  ;;  %v56_v19 = vmax.f32 %v52_v15, 0.0  ;;  %v57_v20 = vmax.f32 %v53_v16, 0.0 }
  0x21   :  { %v58_v21 = vmax.f32 %v54_v17, 0.0 }
  0x22   :  { %v59_v22 = vmin.f32 %v55_v18, 255.0  ;;  %v60_v23 = vmin.f32 %v56_v19, 255.0  ;;  %v61_v24 = vmin.f32 %v57_v20, 255.0 }
  0x23   :  { %v62_v25 = vmin.f32 %v58_v21, 255.0 }
  0x24   :  { %v63_v26 = vmul.f32 0.039215688, %v59_v22  ;;  %v64_v27 = vmul.f32 0.039215688, %v60_v23  ;;  %v485_v28 = vmul.f32 0.039215688, %v61_v24 }
  0x25   :  { %v487_v29 = vmul.f32 0.039215688, %v62_v25 }
  0x26   :  { %v67_v30 = vfloor.f32 %v63_v26  ;;  %v68_v31 = vfloor.f32 %v64_v27  ;;  %v69_v32 = vfloor.f32 %v485_v28 }
  0x27   :  { %v70_v33 = vfloor.f32 %v487_v29 }
  0x28   :  { %v491_v34 = vmin.f32 %v67_v30, 9.0  ;;  %v493_v35 = vmin.f32 %v68_v31, 9.0  ;;  %v495_v36 = vmin.f32 %v69_v32, 9.0 }
  0x29   :  { %v502_v38 = vmin.f32 %v70_v33, 9.0 }
  0x2a   :  { %v498_v37 = vsub.f32 %v63_v26, %v491_v34  ;;  %vm1043_vm0 = vcmp.ge.f32.partialorder %v491_v34, 1.0  ;;  %vm1045_vm1 = vcmp.ge.f32.partialorder %v491_v34, 2.0  ;;  %vm1024_vm2 = vcmp.ge.f32.partialorder %v491_v34, 3.0 }
  0x2b   :  { %vm1023_vm3 = vcmp.ge.f32.partialorder %v491_v34, 4.0  ;;  %vm1034_vm4 = vcmp.ge.f32.partialorder %v491_v34, 5.0  ;;  %vm1030_vm5 = vcmp.ge.f32.partialorder %v491_v34, 6.0  ;;  %vm1027_vm6 = vcmp.ge.f32.partialorder %v491_v34, 7.0 }
  0x2c   :  { %vm1025_vm7 = vcmp.ge.f32.partialorder %v491_v34, 8.0  ;;  %v115_v40 = vsel %vm1043_vm0, 0.282623, %v455_v39  ;;  %v119_v42 = vsel %vm1043_vm0, -0.028687984, %v456_v41  ;;  %vm1026_vm8 = vcmp.ge.f32.partialorder %v491_v34, 9.0 }
  0x2d   :  { %v123_v43 = vsel %vm1045_vm1, 0.253935, %v115_v40  ;;  %v127_v44 = vsel %vm1045_vm1, -0.047179013, %v119_v42  ;;  %vm1032_vm9 = vcmp.ge.f32.partialorder %v493_v35, 1.0  ;;  %vm1028_vm10 = vcmp.ge.f32.partialorder %v493_v35, 2.0 }
  0x2e   :  { %v131_v45 = vsel %vm1024_vm2, 0.206756, %v123_v43  ;;  %v135_v46 = vsel %vm1024_vm2, -0.043130994, %v127_v44  ;;  %vm1029_vm11 = vcmp.ge.f32.partialorder %v493_v35, 3.0  ;;  %vm1031_vm12 = vcmp.ge.f32.partialorder %v493_v35, 4.0 }
  0x2f   :  { %v139_v47 = vsel %vm1023_vm3, 0.163625, %v131_v45  ;;  %v143_v48 = vsel %vm1023_vm3, -0.036056995, %v135_v46  ;;  %vm1033_vm13 = vcmp.ge.f32.partialorder %v493_v35, 5.0  ;;  %vm1040_vm14 = vcmp.ge.f32.partialorder %v493_v35, 6.0 }
  0x30   :  { %v147_v49 = vsel %vm1034_vm4, 0.127568, %v139_v47  ;;  %v151_v50 = vsel %vm1034_vm4, 0.007123992, %v143_v48  ;;  %vm1037_vm15 = vcmp.ge.f32.partialorder %v493_v35, 7.0  ;;  %vm1036_vm3 = vcmp.ge.f32.partialorder %v493_v35, 8.0 }
  0x31   :  { %v155_v51 = vsel %vm1030_vm5, 0.134692, %v147_v49  ;;  %v159_v52 = vsel %vm1030_vm5, 0.13224901, %v151_v50  ;;  %vm1035_vm2 = vcmp.ge.f32.partialorder %v493_v35, 9.0  ;;  %v565_v61 = vsub.f32 %v64_v27, %v493_v35 }
  0x32   :  { %v163_v53 = vsel %vm1027_vm6, 0.266941, %v155_v51  ;;  %v167_v54 = vsel %vm1027_vm6, 0.21056297, %v159_v52  ;;  %v116_v55 = vsel %vm1032_vm9, 0.282623, %v455_v39  ;;  %v615_v17 = vsub.f32 %v485_v28, %v495_v36 }
  0x33   :  { %v171_v56 = vsel %vm1025_vm7, 0.477504, %v163_v53  ;;  %v175_v57 = vsel %vm1025_vm7, 0.26388404, %v167_v54  ;;  %v120_v58 = vsel %vm1032_vm9, -0.028687984, %v456_v41 }
  0x34   :  { %v179_v59 = vsel %vm1026_vm8, 0.741388, %v171_v56  ;;  %v183_v60 = vsel %vm1026_vm8, 0.25185996, %v175_v57  ;;  %v124_v62 = vsel %vm1028_vm10, 0.253935, %v116_v55 }
  0x35   :  { %v187_v63 = vmul.f32 %v183_v60, %v498_v37  ;;  %v128_v0 = vsel %vm1028_vm10, -0.047179013, %v120_v58  ;;  %v132_v1 = vsel %vm1029_vm11, 0.206756, %v124_v62  ;;  %vm1042_vm7 = vcmp.ge.f32.partialorder %v495_v36, 1.0 }
  0x36   :  { %v136_v2 = vsel %vm1029_vm11, -0.043130994, %v128_v0  ;;  %v140_v3 = vsel %vm1031_vm12, 0.163625, %v132_v1  ;;  %vm1038_vm8 = vcmp.ge.f32.partialorder %v495_v36, 2.0  ;;  %vm1039_vm6 = vcmp.ge.f32.partialorder %v495_v36, 3.0 }
  0x37   :  { %v191_v4 = vadd.f32 %v187_v63, %v179_v59  ;;  %v144_v5 = vsel %vm1031_vm12, -0.036056995, %v136_v2  ;;  %v148_v6 = vsel %vm1033_vm13, 0.127568, %v140_v3  ;;  %vm1041_vm10 = vcmp.ge.f32.partialorder %v495_v36, 4.0 }
  0x38   :  { %v152_v7 = vsel %vm1033_vm13, 0.007123992, %v144_v5  ;;  %v156_v8 = vsel %vm1040_vm14, 0.134692, %v148_v6  ;;  %vm97_vm11 = vcmp.ge.f32.partialorder %v495_v36, 5.0  ;;  %vm101_vm5 = vcmp.ge.f32.partialorder %v495_v36, 6.0 }
  0x39   :  { %195 = vst [vmem:[#allocation7] sm:$0xff] %v191_v4  ;;  %v160_v9 = vsel %vm1040_vm14, 0.13224901, %v152_v7  ;;  %v164_v10 = vsel %vm1037_vm15, 0.266941, %v156_v8  ;;  %vm105_vm12 = vcmp.ge.f32.partialorder %v495_v36, 7.0  ;;  %v694_v60 = vsub.f32 %v487_v29, %v502_v38 }
  0x3a   :  { %vm109_vm9 = vcmp.ge.f32.partialorder %v495_v36, 8.0  ;;  %v168_v11 = vsel %vm1037_vm15, 0.21056297, %v160_v9  ;;  %v172_v12 = vsel %vm1036_vm3, 0.477504, %v164_v10  ;;  %vm113_vm13 = vcmp.ge.f32.partialorder %v495_v36, 9.0 }
  0x3b   :  { %vm82_vm4 = vcmp.ge.f32.partialorder %v502_v38, 1.0  ;;  %v176_v13 = vsel %vm1036_vm3, 0.26388404, %v168_v11  ;;  %v180_v14 = vsel %vm1035_vm2, 0.741388, %v172_v12  ;;  %vm90_vm3 = vcmp.ge.f32.partialorder %v502_v38, 3.0 }
  0x3c   :  { %v117_v15 = vsel %vm1042_vm7, 0.282623, %v455_v39  ;;  %v184_v16 = vsel %vm1035_vm2, 0.25185996, %v176_v13  ;;  %v121_v18 = vsel %vm1042_vm7, -0.028687984, %v456_v41 }
  0x3d   :  { %v125_v19 = vsel %vm1038_vm8, 0.253935, %v117_v15  ;;  %v188_v20 = vmul.f32 %v184_v16, %v565_v61  ;;  %v129_v21 = vsel %vm1038_vm8, -0.047179013, %v121_v18  ;;  %vm86_vm2 = vcmp.ge.f32.partialorder %v502_v38, 2.0 }
  0x3e   :  { %v133_v22 = vsel %vm1039_vm6, 0.206756, %v125_v19  ;;  %v137_v23 = vsel %vm1039_vm6, -0.043130994, %v129_v21  ;;  %vm94_vm15 = vcmp.ge.f32.partialorder %v502_v38, 4.0  ;;  %vm1049_vm8 = vcmp.ge.f32.partialorder %v502_v38, 5.0 }
  0x3f   :  { %v141_v24 = vsel %vm1041_vm10, 0.163625, %v133_v22  ;;  %v192_v25 = vadd.f32 %v188_v20, %v180_v14  ;;  %v145_v26 = vsel %vm1041_vm10, -0.036056995, %v137_v23  ;;  %vm1044_vm6 = vcmp.ge.f32.partialorder %v502_v38, 6.0 }
  0x40   :  { %v149_v27 = vsel %vm97_vm11, 0.127568, %v141_v24  ;;  %v153_v28 = vsel %vm97_vm11, 0.007123992, %v145_v26  ;;  %vm1046_vm14 = vcmp.ge.f32.partialorder %v502_v38, 7.0  ;;  %vm1047_vm10 = vcmp.ge.f32.partialorder %v502_v38, 8.0 }
  0x41   :  { %v157_v30 = vsel %vm101_vm5, 0.134692, %v149_v27  ;;  %196 = vst [vmem:[#allocation7 + $0x8] sm:$0xff] %v192_v25  ;;  %v161_v31 = vsel %vm101_vm5, 0.13224901, %v153_v28  ;;  %vm1048_vm7 = vcmp.ge.f32.partialorder %v502_v38, 9.0 }
  0x42   :  { %v165_v32 = vsel %vm105_vm12, 0.266941, %v157_v30  ;;  %v169_v33 = vsel %vm105_vm12, 0.21056297, %v161_v31  ;;  %v118_v42 = vsel %vm82_vm4, 0.282623, %v455_v39 }
  0x43   :  { %v173_v40 = vsel %vm109_vm9, 0.477504, %v165_v32  ;;  %v177_v43 = vsel %vm109_vm9, 0.26388404, %v169_v33  ;;  %v122_v45 = vsel %vm82_vm4, -0.028687984, %v456_v41 }
  0x44   :  { %v181_v44 = vsel %vm113_vm13, 0.741388, %v173_v40  ;;  %v185_v46 = vsel %vm113_vm13, 0.25185996, %v177_v43  ;;  %v126_v47 = vsel %vm86_vm2, 0.253935, %v118_v42 }
  0x45   :  { %v130_v48 = vsel %vm86_vm2, -0.047179013, %v122_v45  ;;  %v189_v39 = vmul.f32 %v185_v46, %v615_v17  ;;  %v134_v49 = vsel %vm90_vm3, 0.206756, %v126_v47  ;;  %v457_v51 = vmov 0.004874  }
  0x46   :  { %v138_v50 = vsel %vm90_vm3, -0.043130994, %v130_v48  ;;  %v199_v41 = vsel %vm1043_vm0, 0.140926, %v457_v51  ;;  %v142_v52 = vsel %vm94_vm15, 0.163625, %v134_v49 }
  0x47   :  { %v146_v53 = vsel %vm94_vm15, -0.036056995, %v138_v50  ;;  %v458_v54 = vmov 0.136052   ;;  %v193_v56 = vadd.f32 %v189_v39, %v181_v44  ;;  %v150_v57 = vsel %vm1049_vm8, 0.127568, %v142_v52 }
  0x48   :  { %v203_v55 = vsel %vm1043_vm0, 0.12432799, %v458_v54  ;;  %v154_v58 = vsel %vm1049_vm8, 0.007123992, %v146_v53  ;;  %v207_v59 = vsel %vm1045_vm1, 0.265254, %v199_v41 }
  0x49   :  { %v158_v62 = vsel %vm1044_vm6, 0.134692, %v150_v57  ;;  %v162_v63 = vsel %vm1044_vm6, 0.13224901, %v154_v58  ;;  %v211_v0 = vsel %vm1045_vm1, 0.10650402, %v203_v55 }
  0x4a   :  { %197 = vst [vmem:[#allocation7 + $0x10] sm:$0xff] %v193_v56  ;;  %v166_v1 = vsel %vm1046_vm14, 0.266941, %v158_v62  ;;  %v170_v2 = vsel %vm1046_vm14, 0.21056297, %v162_v63  ;;  %vm1050_vm0 = vcmp.ge.f32.partialorder %v491_v34, 3.0 }
  0x4b   :  { %v215_v29 = vsel %vm1050_vm0, 0.371758, %v207_v59  ;;  %v174_v3 = vsel %vm1047_vm10, 0.477504, %v166_v1  ;;  %v178_v4 = vsel %vm1047_vm10, 0.26388404, %v170_v2  ;;  %vm1051_vm6 = vmmov %vm1050_vm0 }
  0x4c   :  { %v219_v5 = vsel %vm1051_vm6, 0.09937498, %v211_v0  ;;  %v182_v6 = vsel %vm1048_vm7, 0.741388, %v174_v3  ;;  %v186_v7 = vsel %vm1048_vm7, 0.25185996, %v178_v4 }
  0x4d   :  { %vm1052_vm1 = vcmp.ge.f32.partialorder %v491_v34, 4.0  ;;  %v190_v9 = vmul.f32 %v186_v7, %v694_v60  ;;  %vm1054_vm14 = vcmp.ge.f32.partialorder %v491_v34, 5.0  ;;  %vm1055_vm6 = vcmp.ge.f32.partialorder %v493_v35, 1.0 }
  0x4e   :  { %v223_v8 = vsel %vm1052_vm1, 0.471133, %v215_v29  ;;  %vm1053_vm0 = vmmov %vm1052_vm1  ;;  %v200_v12 = vsel %vm1055_vm6, 0.140926, %v457_v51  ;;  %vm1057_vm7 = vcmp.ge.f32.partialorder %v491_v34, 6.0  ;;  %vm1061_vm8 = vcmp.ge.f32.partialorder %v493_v35, 2.0 }
  0x4f   :  { %v227_v10 = vsel %vm1053_vm0, 0.095816016, %v219_v5  ;;  %v231_v11 = vsel %vm1054_vm14, 0.566949, %v223_v8  ;;  %vm1056_vm10 = vmmov %vm1054_vm14  ;;  %v194_v16 = vadd.f32 %v190_v9, %v182_v6  ;;  %vm1060_vm14 = vcmp.ge.f32.partialorder %v491_v34, 7.0 }
  0x50   :  { %v235_v13 = vsel %vm1056_vm10, 0.091686964, %v227_v10  ;;  %v239_v14 = vsel %vm1057_vm7, 0.658636, %v231_v11  ;;  %vm1058_vm1 = vmmov %vm1055_vm6  ;;  %v208_v20 = vsel %vm1061_vm8, 0.265254, %v200_v12 }
  0x51   :  { %v204_v15 = vsel %vm1058_vm1, 0.12432799, %v458_v54  ;;  %vm1059_vm0 = vmmov %vm1057_vm7  ;;  %v247_v19 = vsel %vm1060_vm14, 0.748751, %v239_v14  ;;  %vm1063_vm10 = vcmp.ge.f32.partialorder %v491_v34, 8.0  ;;  %198 = vst [vmem:[#allocation7 + $0x18] sm:$0xff] %v194_v16 }
  0x52   :  { %v243_v18 = vsel %vm1059_vm0, 0.09011501, %v235_v13  ;;  %vm1062_vm6 = vmmov %vm1060_vm14  ;;  %v255_v22 = vsel %vm1063_vm10, 0.821444, %v247_v19  ;;  %vm1066_vm0 = vcmp.ge.f32.partialorder %v491_v34, 9.0  ;;  %vm1067_vm14 = vcmp.ge.f32.partialorder %v493_v35, 3.0 }
  0x53   :  { %v251_v21 = vsel %vm1062_vm6, 0.07269299, %v243_v18  ;;  %vm1064_vm7 = vmmov %vm1061_vm8  ;;  %v263_v25 = vsel %vm1066_vm0, 0.873449, %v255_v22  ;;  %v216_v26 = vsel %vm1067_vm14, 0.371758, %v208_v20 }
  0x54   :  { %v212_v23 = vsel %vm1064_vm7, 0.10650402, %v204_v15  ;;  %vm1065_vm1 = vmmov %vm1063_vm10  ;;  %vm1070_vm10 = vcmp.ge.f32.partialorder %v493_v35, 4.0  ;;  %v202_v63 = vsel %vm82_vm4, 0.140926, %v457_v51 }
  0x55   :  { %v259_v24 = vsel %vm1065_vm1, 0.052005053, %v251_v21  ;;  %vm1068_vm8 = vmmov %vm1066_vm0  ;;  %v224_v30 = vsel %vm1070_vm10, 0.471133, %v216_v26  ;;  %vm1072_vm1 = vcmp.ge.f32.partialorder %v493_v35, 5.0  ;;  %vm1073_vm0 = vcmp.ge.f32.partialorder %v495_v36, 1.0 }
  0x56   :  { %v267_v27 = vsel %vm1068_vm8, 0.03270799, %v259_v24  ;;  %vm1069_vm6 = vmmov %vm1067_vm14  ;;  %v232_v33 = vsel %vm1072_vm1, 0.566949, %v224_v30  ;;  %v201_v40 = vsel %vm1073_vm0, 0.140926, %v457_v51 }
  0x57   :  { %v220_v28 = vsel %vm1069_vm6, 0.09937498, %v212_v23  ;;  %v271_v31 = vmul.f32 %v267_v27, %v498_v37  ;;  %vm1071_vm7 = vmmov %vm1070_vm10  ;;  %vm1075_vm8 = vcmp.ge.f32.partialorder %v493_v35, 6.0  ;;  %v206_v2 = vsel %vm82_vm4, 0.12432799, %v458_v54 }
  0x58   :  { %v228_v32 = vsel %vm1071_vm7, 0.095816016, %v220_v28  ;;  %vm1074_vm14 = vmmov %vm1072_vm1  ;;  %v240_v43 = vsel %vm1075_vm8, 0.658636, %v232_v33  ;;  %vm1078_vm7 = vcmp.ge.f32.partialorder %v493_v35, 7.0  ;;  %vm1079_vm1 = vcmp.ge.f32.partialorder %v495_v36, 2.0 }
  0x59   :  { %v236_v42 = vsel %vm1074_vm14, 0.091686964, %v228_v32  ;;  %vm1076_vm6 = vmmov %vm1073_vm0  ;;  %v275_v45 = vadd.f32 %v271_v31, %v263_v25  ;;  %v248_v47 = vsel %vm1078_vm7, 0.748751, %v240_v43  ;;  %v209_v48 = vsel %vm1079_vm1, 0.265254, %v201_v40 }
  0x5a   :  { %v205_v44 = vsel %vm1076_vm6, 0.12432799, %v458_v54  ;;  %vm1077_vm10 = vmmov %vm1075_vm8  ;;  %vm1081_vm14 = vcmp.ge.f32.partialorder %v493_v35, 8.0  ;;  %v210_v51 = vsel %vm86_vm2, 0.265254, %v202_v63 }
  0x5b   :  { %v244_v46 = vsel %vm1077_vm10, 0.09011501, %v236_v42  ;;  %vm1080_vm0 = vmmov %vm1078_vm7  ;;  %v256_v49 = vsel %vm1081_vm14, 0.821444, %v248_v47  ;;  %280 = vst [vmem:[#allocation7 + $0x20] sm:$0xff] %v275_v45  ;;  %vm1084_vm10 = vcmp.ge.f32.partialorder %v493_v35, 9.0 }
  0x5c   :  { %v252_v39 = vsel %vm1080_vm0, 0.07269299, %v244_v46  ;;  %vm1082_vm8 = vmmov %vm1079_vm1  ;;  %v264_v52 = vsel %vm1084_vm10, 0.873449, %v256_v49  ;;  %vm1085_vm7 = vcmp.ge.f32.partialorder %v495_v36, 3.0 }
  0x5d   :  { %v213_v50 = vsel %vm1082_vm8, 0.10650402, %v205_v44  ;;  %vm1083_vm6 = vmmov %vm1081_vm14  ;;  %v217_v53 = vsel %vm1085_vm7, 0.371758, %v209_v48  ;;  %vm1088_vm14 = vcmp.ge.f32.partialorder %v495_v36, 4.0 }
  0x5e   :  { %v260_v41 = vsel %vm1083_vm6, 0.052005053, %v252_v39  ;;  %vm1086_vm1 = vmmov %vm1084_vm10  ;;  %v225_v57 = vsel %vm1088_vm14, 0.471133, %v217_v53  ;;  %v214_v7 = vsel %vm86_vm2, 0.10650402, %v206_v2 }
  0x5f   :  { %v268_v55 = vsel %vm1086_vm1, 0.03270799, %v260_v41  ;;  %vm1087_vm0 = vmmov %vm1085_vm7  ;;  %v233_v62 = vsel %vm97_vm11, 0.566949, %v225_v57  ;;  %v218_v9 = vsel %vm90_vm3, 0.371758, %v210_v51 }
  0x60   :  { %v221_v56 = vsel %vm1087_vm0, 0.09937498, %v213_v50  ;;  %v272_v58 = vmul.f32 %v268_v55, %v565_v61  ;;  %vm1089_vm8 = vmmov %vm1088_vm14  ;;  %v241_v1 = vsel %vm101_vm5, 0.658636, %v233_v62  ;;  %v222_v11 = vsel %vm90_vm3, 0.09937498, %v214_v7 }
  0x61   :  { %v229_v59 = vsel %vm1089_vm8, 0.095816016, %v221_v56  ;;  %v249_v4 = vsel %vm105_vm12, 0.748751, %v241_v1  ;;  %v226_v12 = vsel %vm94_vm15, 0.471133, %v218_v9 }
  0x62   :  { %v237_v0 = vsel %vm97_vm11, 0.091686964, %v229_v59  ;;  %v276_v29 = vadd.f32 %v272_v58, %v264_v52  ;;  %v257_v6 = vsel %vm109_vm9, 0.821444, %v249_v4  ;;  %v230_v14 = vsel %vm94_vm15, 0.095816016, %v222_v11 }
  0x63   :  { %v245_v3 = vsel %vm101_vm5, 0.09011501, %v237_v0  ;;  %v265_v8 = vsel %vm113_vm13, 0.873449, %v257_v6  ;;  %vm1090_vm6 = vcmp.ge.f32.partialorder %v502_v38, 5.0  ;;  %vm1091_vm10 = vcmp.ge.f32.partialorder %v491_v34, 1.0 }
  0x64   :  { %v253_v5 = vsel %vm105_vm12, 0.07269299, %v245_v3  ;;  %281 = vst [vmem:[#allocation7 + $0x28] sm:$0xff] %v276_v29  ;;  %v234_v15 = vsel %vm1090_vm6, 0.566949, %v226_v12  ;;  %vm1092_vm7 = vmmov %vm1090_vm6  ;;  %vm1093_vm1 = vcmp.ge.f32.partialorder %v502_v38, 6.0 }
  0x65   :  { %v261_v54 = vsel %vm109_vm9, 0.052005053, %v253_v5  ;;  %v459_v16 = vmov 0.329415   ;;  %v238_v19 = vsel %vm1092_vm7, 0.091686964, %v230_v14  ;;  %vm1094_vm0 = vmmov %vm1091_vm10 }
  0x66   :  { %v269_v10 = vsel %vm113_vm13, 0.03270799, %v261_v54  ;;  %v284_v18 = vsel %vm1091_vm10, 0.457517, %v459_v16  ;;  %v242_v20 = vsel %vm1093_vm1, 0.658636, %v234_v15  ;;  %vm1095_vm14 = vmmov %vm1093_vm1 }
  0x67   :  { %v273_v13 = vmul.f32 %v269_v10, %v615_v17  ;;  %v460_v21 = vmov 0.128102   ;;  %v246_v24 = vsel %vm1095_vm14, 0.09011501, %v238_v19  ;;  %vm1096_vm8 = vcmp.ge.f32.partialorder %v502_v38, 7.0 }
  0x68   :  { %v288_v22 = vsel %vm1094_vm0, 0.072465986, %v460_v21  ;;  %v250_v25 = vsel %vm1096_vm8, 0.748751, %v242_v20  ;;  %vm1097_vm6 = vcmp.ge.f32.partialorder %v491_v34, 2.0  ;;  %vm1098_vm10 = vmmov %vm1096_vm8  ;;  %vm1099_vm7 = vcmp.ge.f32.partialorder %v502_v38, 8.0 }
  0x69   :  { %v277_v23 = vadd.f32 %v273_v13, %v265_v8  ;;  %v292_v26 = vsel %vm1097_vm6, 0.529983, %v284_v18  ;;  %v254_v27 = vsel %vm1098_vm10, 0.07269299, %v246_v24  ;;  %v258_v28 = vsel %vm1099_vm7, 0.821444, %v250_v25  ;;  %vm1100_vm1 = vmmov %vm1097_vm6 }
  0x6a   :  { %v296_v30 = vsel %vm1100_vm1, 0.023133993, %v288_v22  ;;  %vm1101_vm0 = vmmov %vm1099_vm7  ;;  %vm1102_vm14 = vcmp.ge.f32.partialorder %v502_v38, 9.0  ;;  %vm1103_vm8 = vcmp.ge.f32.partialorder %v491_v34, 3.0  ;;  %vm1106_vm7 = vcmp.ge.f32.partialorder %v491_v34, 4.0 }
  0x6b   :  { %282 = vst [vmem:[#allocation7 + $0x30] sm:$0xff] %v277_v23  ;;  %v262_v31 = vsel %vm1101_vm0, 0.052005053, %v254_v27  ;;  %v266_v32 = vsel %vm1102_vm14, 0.873449, %v258_v28  ;;  %vm1104_vm6 = vmmov %vm1102_vm14  ;;  %vm1108_vm0 = vcmp.ge.f32.partialorder %v491_v34, 5.0 }
  0x6c   :  { %v300_v33 = vsel %vm1103_vm8, 0.553117, %v292_v26  ;;  %v270_v40 = vsel %vm1104_vm6, 0.03270799, %v262_v31  ;;  %vm1105_vm10 = vmmov %vm1103_vm8  ;;  %vm1109_vm14 = vcmp.ge.f32.partialorder %v493_v35, 1.0  ;;  %vm1111_vm6 = vcmp.ge.f32.partialorder %v491_v34, 6.0 }
  0x6d   :  { %v304_v42 = vsel %vm1105_vm10, 0.0050310493, %v296_v30  ;;  %v308_v43 = vsel %vm1106_vm7, 0.558148, %v300_v33  ;;  %v274_v44 = vmul.f32 %v270_v40, %v694_v60  ;;  %vm1107_vm1 = vmmov %vm1106_vm7  ;;  %v285_v47 = vsel %vm1109_vm14, 0.457517, %v459_v16 }
  0x6e   :  { %v312_v45 = vsel %vm1107_vm1, -0.0075920224, %v304_v42  ;;  %v316_v46 = vsel %vm1108_vm0, 0.550556, %v308_v43  ;;  %vm1110_vm8 = vmmov %vm1108_vm0  ;;  %vm1114_vm1 = vcmp.ge.f32.partialorder %v491_v34, 7.0  ;;  %vm1115_vm0 = vcmp.ge.f32.partialorder %v493_v35, 2.0 }
  0x6f   :  { %v320_v48 = vsel %vm1110_vm8, -0.03290701, %v312_v45  ;;  %v324_v39 = vsel %vm1111_vm6, 0.517649, %v316_v46  ;;  %vm1112_vm10 = vmmov %vm1109_vm14  ;;  %v278_v50 = vadd.f32 %v274_v44, %v266_v32  ;;  %v293_v53 = vsel %vm1115_vm0, 0.529983, %v285_v47 }
  0x70   :  { %v289_v49 = vsel %vm1112_vm10, 0.072465986, %v460_v21  ;;  %vm1113_vm7 = vmmov %vm1111_vm6  ;;  %v332_v52 = vsel %vm1114_vm1, 0.440573, %v324_v39  ;;  %vm1117_vm8 = vcmp.ge.f32.partialorder %v491_v34, 8.0 }
  0x71   :  { %v328_v41 = vsel %vm1113_vm7, -0.07707599, %v320_v48  ;;  %vm1116_vm14 = vmmov %vm1114_vm1  ;;  %v340_v56 = vsel %vm1117_vm8, 0.318195, %v332_v52  ;;  %283 = vst [vmem:[#allocation7 + $0x38] sm:$0xff] %v278_v50  ;;  %vm1120_vm7 = vcmp.ge.f32.partialorder %v491_v34, 9.0 }
  0x72   :  { %v336_v55 = vsel %vm1116_vm14, -0.12237802, %v328_v41  ;;  %vm1118_vm6 = vmmov %vm1115_vm0  ;;  %v348_v59 = vsel %vm1120_vm7, 0.149561, %v340_v56  ;;  %vm1121_vm1 = vcmp.ge.f32.partialorder %v493_v35, 3.0 }
  0x73   :  { %v297_v57 = vsel %vm1118_vm6, 0.023133993, %v289_v49  ;;  %vm1119_vm10 = vmmov %vm1117_vm8  ;;  %v301_v62 = vsel %vm1121_vm1, 0.553117, %v293_v53  ;;  %vm1124_vm8 = vcmp.ge.f32.partialorder %v493_v35, 4.0 }
  0x74   :  { %v344_v58 = vsel %vm1119_vm10, -0.16863398, %v336_v55  ;;  %vm1122_vm0 = vmmov %vm1120_vm7  ;;  %v309_v1 = vsel %vm1124_vm8, 0.558148, %v301_v62  ;;  %vm1126_vm10 = vcmp.ge.f32.partialorder %v493_v35, 5.0  ;;  %vm1127_vm7 = vcmp.ge.f32.partialorder %v495_v36, 1.0 }
  0x75   :  { %v352_v63 = vsel %vm1122_vm0, -0.0056250095, %v344_v58  ;;  %vm1123_vm14 = vmmov %vm1121_vm1  ;;  %v317_v3 = vsel %vm1126_vm10, 0.550556, %v309_v1  ;;  %v286_v4 = vsel %vm1127_vm7, 0.457517, %v459_v16 }
  0x76   :  { %v305_v0 = vsel %vm1123_vm14, 0.0050310493, %v297_v57  ;;  %v356_v2 = vmul.f32 %v352_v63, %v498_v37  ;;  %vm1125_vm6 = vmmov %vm1124_vm8  ;;  %vm1129_vm0 = vcmp.ge.f32.partialorder %v493_v35, 6.0  ;;  %v287_v23 = vsel %vm82_vm4, 0.457517, %v459_v16 }
  0x77   :  { %v313_v29 = vsel %vm1125_vm6, -0.0075920224, %v305_v0  ;;  %vm1128_vm1 = vmmov %vm1126_vm10  ;;  %v325_v51 = vsel %vm1129_vm0, 0.517649, %v317_v3  ;;  %vm1132_vm6 = vcmp.ge.f32.partialorder %v493_v35, 7.0  ;;  %vm1133_vm10 = vcmp.ge.f32.partialorder %v495_v36, 2.0 }
  0x78   :  { %v321_v34 = vsel %vm1128_vm1, -0.03290701, %v313_v29  ;;  %vm1130_vm14 = vmmov %vm1127_vm7  ;;  %v360_v5 = vadd.f32 %v356_v2, %v348_v59  ;;  %v333_v7 = vsel %vm1132_vm6, 0.440573, %v325_v51  ;;  %v294_v54 = vsel %vm1133_vm10, 0.529983, %v286_v4 }
  0x79   :  { %v290_v37 = vsel %vm1130_vm14, 0.072465986, %v460_v21  ;;  %vm1131_vm8 = vmmov %vm1129_vm0  ;;  %vm1135_vm1 = vcmp.ge.f32.partialorder %v493_v35, 8.0  ;;  %v295_v16 = vsel %vm86_vm2, 0.529983, %v287_v23 }
  0x7a   :  { %v329_v6 = vsel %vm1131_vm8, -0.07707599, %v321_v34  ;;  %vm1134_vm7 = vmmov %vm1132_vm6  ;;  %v341_v9 = vsel %vm1135_vm1, 0.318195, %v333_v7  ;;  %365 = vst [vmem:[#allocation7 + $0x40] sm:$0xff] %v360_v5  ;;  %vm1138_vm8 = vcmp.ge.f32.partialorder %v493_v35, 9.0 }
  0x7b   :  { %v337_v8 = vsel %vm1134_vm7, -0.12237802, %v329_v6  ;;  %vm1136_vm0 = vmmov %vm1133_vm10  ;;  %v349_v12 = vsel %vm1138_vm8, 0.149561, %v341_v9  ;;  %vm1139_vm6 = vcmp.ge.f32.partialorder %v495_v36, 3.0 }
  0x7c   :  { %v298_v10 = vsel %vm1136_vm0, 0.023133993, %v290_v37  ;;  %vm1137_vm14 = vmmov %vm1135_vm1  ;;  %v302_v13 = vsel %vm1139_vm6, 0.553117, %v294_v54  ;;  %vm1142_vm1 = vcmp.ge.f32.partialorder %v495_v36, 4.0 }
  0x7d   :  { %v345_v11 = vsel %vm1137_vm14, -0.16863398, %v337_v8  ;;  %vm1140_vm10 = vmmov %vm1138_vm8  ;;  %v310_v18 = vsel %vm1142_vm1, 0.558148, %v302_v13  ;;  %v303_v33 = vsel %vm90_vm3, 0.553117, %v295_v16 }
  0x7e   :  { %v353_v14 = vsel %vm1140_vm10, -0.0056250095, %v345_v11  ;;  %vm1141_vm7 = vmmov %vm1139_vm6  ;;  %v318_v22 = vsel %vm97_vm11, 0.550556, %v310_v18  ;;  %v311_v43 = vsel %vm94_vm15, 0.558148, %v303_v33 }
  0x7f   :  { %v306_v15 = vsel %vm1141_vm7, 0.0050310493, %v298_v10  ;;  %v357_v19 = vmul.f32 %v353_v14, %v565_v61  ;;  %vm1143_vm0 = vmmov %vm1142_vm1  ;;  %v326_v24 = vsel %vm101_vm5, 0.517649, %v318_v22  ;;  %v291_v61 = vsel %vm82_vm4, 0.072465986, %v460_v21 }
  0x80   :  { %v314_v20 = vsel %vm1143_vm0, -0.0075920224, %v306_v15  ;;  %v334_v27 = vsel %vm105_vm12, 0.440573, %v326_v24  ;;  %v299_v31 = vsel %vm86_vm2, 0.023133993, %v291_v61 }
  0x81   :  { %v322_v35 = vsel %vm97_vm11, -0.03290701, %v314_v20  ;;  %v361_v25 = vadd.f32 %v357_v19, %v349_v12  ;;  %v342_v30 = vsel %vm109_vm9, 0.318195, %v334_v27  ;;  %v307_v42 = vsel %vm90_vm3, 0.0050310493, %v299_v31 }
  0x82   :  { %v330_v26 = vsel %vm101_vm5, -0.07707599, %v322_v35  ;;  %v350_v32 = vsel %vm113_vm13, 0.149561, %v342_v30  ;;  %v315_v45 = vsel %vm94_vm15, -0.0075920224, %v307_v42 }
  0x83   :  { %v338_v28 = vsel %vm105_vm12, -0.12237802, %v330_v26  ;;  %366 = vst [vmem:[#allocation7 + $0x48] sm:$0xff] %v361_v25  ;;  %vm1144_vm2 = vcmp.ge.f32.partialorder %v502_v38, 5.0  ;;  %vm1146_vm5 = vcmp.ge.f32.partialorder %v502_v38, 6.0  ;;  %vm1150_vm12 = vcmp.ge.f32.partialorder %v502_v38, 8.0 }
  0x84   :  { %v346_v21 = vsel %vm109_vm9, -0.16863398, %v338_v28  ;;  %v319_v46 = vsel %vm1144_vm2, 0.550556, %v311_v43  ;;  %vm1145_vm4 = vmmov %vm1144_vm2  ;;  %vm1148_vm9 = vcmp.ge.f32.partialorder %v502_v38, 7.0  ;;  %vm1152_vm15 = vcmp.ge.f32.partialorder %v502_v38, 9.0 }
  0x85   :  { %v354_v40 = vsel %vm113_vm13, -0.0056250095, %v346_v21  ;;  %v323_v47 = vsel %vm1145_vm4, -0.03290701, %v315_v45  ;;  %v327_v36 = vsel %vm1146_vm5, 0.517649, %v319_v46  ;;  %vm1147_vm3 = vmmov %vm1146_vm5 }
  0x86   :  { %v358_v44 = vmul.f32 %v354_v40, %v615_v17  ;;  %v331_v39 = vsel %vm1147_vm3, -0.07707599, %v323_v47  ;;  %v335_v49 = vsel %vm1148_vm9, 0.440573, %v327_v36  ;;  %vm1149_vm11 = vmmov %vm1148_vm9 }
  0x87   :  { %v339_v17 = vsel %vm1149_vm11, -0.12237802, %v331_v39  ;;  %v343_v50 = vsel %vm1150_vm12, 0.318195, %v335_v49  ;;  %vm1151_vm13 = vmmov %vm1150_vm12 }
  0x88   :  { %v362_v48 = vadd.f32 %v358_v44, %v350_v32  ;;  %v347_v41 = vsel %vm1151_vm13, -0.16863398, %v339_v17  ;;  %v351_v52 = vsel %vm1152_vm15, 0.149561, %v343_v50  ;;  %vm1153_vm14 = vmmov %vm1152_vm15 }
  0x89   :  { %v355_v53 = vsel %vm1153_vm14, -0.0056250095, %v347_v41 }
  0x8a   :  { %367 = vst [vmem:[#allocation7 + $0x50] sm:$0xff] %v362_v48  ;;  %v359_v55 = vmul.f32 %v355_v53, %v694_v60 }
  0x8c   :  { %v363_v56 = vadd.f32 %v359_v55, %v351_v52 }
  0x8e   :  { %368 = vst [vmem:[#allocation7 + $0x58] sm:$0xff] %v363_v56 }
  0x8f   :  { %438 = shalt.err (!%p435_p9)
}
  0x90   :  { %s462_s20 = smov 512   ;;  %s463_s21 = smov 32  }
  0x91   :  { %380 = dma.vmem_to_hbm [thread:$0]  %s375_s18, 1536, %s1022_s2, [#allocation4], %s462_s20, %s462_s20, %s463_s21  }
  0x92   :  { %451 = dma.done.wait [#allocation4], 1536  }
  0x93   :  { %452 = vsyncadd [#allocation4], 4294965760 }
  0x94   :  { %384 = vsyncpa [#allocation3], 1 }
  0x95   :  { %385 = vsyncpa [#allocation4], 1 }
  0x96   :  { %386 = vsyncpa [#allocation5], 1 }

</bundles_post_ra>
